<compile_context>
chip_gen: v7x
topology: tpu7x:2x2x1
jax: 0.10.0
libtpu: 0.0.40
codegen_flags: <defaults>
</compile_context>

<pallas_src>
import math

import jax
import jax.numpy as jnp
from jax.experimental import pallas as pl
from jax.experimental.pallas import tpu as pltpu
from jax.scipy.special import erf as _erf_exact


# ----------------------------------------------------------------------------
# In-kernel activations
# ----------------------------------------------------------------------------
def _erf_kernel(x):
    # Abramowitz & Stegun 7.1.26 rational approximation (|err| <= 1.5e-7),
    # built only from VPU/EUP ops that Mosaic definitely lowers.
    # TODO(synk): switch to jax.lax.erf once erf_p lowering in Pallas-TPU is relied on.
    p = 0.3275911
    a1, a2, a3, a4, a5 = (0.254829592, -0.284496736, 1.421413741,
                          -1.453152027, 1.061405429)
    z = jnp.abs(x)
    t = 1.0 / (1.0 + p * z)
    poly = ((((a5 * t + a4) * t + a3) * t + a2) * t + a1) * t
    y = 1.0 - poly * jnp.exp(-z * z)
    return jnp.where(x >= 0.0, y, -y)


def _gelu_kernel(x):
    # Mirrors the PyTorch helper: 0.5 * x * (1 + erf(x / sqrt(2))).
    return 0.5 * x * (1.0 + _erf_kernel(x * (1.0 / math.sqrt(2.0))))


_KERNEL_ACTS = {
    "relu": lambda x: jnp.maximum(x, 0.0),
    "gelu": _gelu_kernel,
    "sigmoid": jax.nn.sigmoid,
}


# ----------------------------------------------------------------------------
# Fused kernel body (one program = TB sequences, rows = TB*L)
# ----------------------------------------------------------------------------
def _make_tokens_to_emb_kernel(L, V, rows, layer_meta, act_name):
    """layer_meta: tuple of (kernel_size, c_in, c_out, apply_activation)."""
    act = _KERNEL_ACTS[act_name]
    n_layers = len(layer_meta)

    def kernel(*refs):
        tok_ref, pos_ref, emb_ref = refs[0], refs[1], refs[2]
        wb_refs = refs[3:3 + 2 * n_layers]
        o_ref = refs[3 + 2 * n_layers]

        tok = tok_ref[...]                                    # (rows, 1) int32
        pos = pos_ref[...]                                    # (rows, 1) int32

        # --- nn.Embedding lookup, fused as a one-hot MXU matmul ------------
        vocab_ids = jax.lax.broadcasted_iota(jnp.int32, (rows, V), 1)
        onehot = jnp.where(vocab_ids == tok, 1.0, 0.0)        # (rows, V) f32
        h = jnp.dot(onehot, emb_ref[...],
                    preferred_element_type=jnp.float32)       # (rows, E)

        # --- ConvSegments + final 1x1 conv, one unfolded matmul each -------
        for i, (k, c_in, c_out, apply_act) in enumerate(layer_meta):
            w = wb_refs[2 * i][...]                           # (k*c_in, c_out)
            b = wb_refs[2 * i + 1][...]                       # (1, c_out)
            if k > 1:
                # PadLayer(k-1, 0): right-zero-pad each sequence, then unfold
                # the k look-ahead taps along the lane (channel) axis.  The
                # activation slab is flat over (batch_tile * L), so taps that
                # would read past a sequence end are zeroed with a mask built
                # from the per-row position (no cross-sequence leakage).
                hpad = jnp.concatenate(
                    [h, jnp.zeros((k - 1, c_in), jnp.float32)], axis=0)
                taps = []
                for j in range(k):
                    tap = hpad[j:j + rows, :]                 # (rows, c_in)
                    if j > 0:
                        maskf = (pos < (L - j)).astype(jnp.float32)  # (rows,1)
                        tap = tap * maskf
                    taps.append(tap)
                xunf = jnp.concatenate(taps, axis=1)          # (rows, k*c_in)
            else:
                xunf = h
            h = jnp.dot(xunf, w, preferred_element_type=jnp.float32) + b
            if apply_act:
                h = act(h)

        o_ref[...] = h.astype(o_ref.dtype)                    # (rows, T)

    return kernel


# ----------------------------------------------------------------------------
# Module wrapper (forward only — end_of_word heads are unused in forward())
# ----------------------------------------------------------------------------
class TokensToEmb:
    """JAX/Pallas counterpart of the PyTorch TokensToEmb module."""

    def __init__(self, h, key):
        self.h = dict(h)
        if h["seg1_type"] != "conv":
            # TODO(synk): seg1_type='unfold' (IdentityConv) path not wired into
            # the fused kernel; this config uses the 'conv' path.
            raise NotImplementedError("seg1_type='unfold' not implemented")

        keys = iter(jax.random.split(key, 32))
        V = h["char_vocab_size"]
        E = h["char_embedding_size"]
        T = h["token_embedding_size"]

        self.emb = jax.random.normal(next(keys), (V, E), jnp.float32)

        # seg1 + seg2 conv layers (with activation) + final 1x1 conv (no act).
        # Weights kept in "math" layout w[j, c_in, c_out]  (== torch weight[o,c,j].T).
        self.layers = []
        c_in = E
        for (k, f) in list(h["seg1.kernel|filter_sizes"]) + list(
                h["seg2.kernel|filter_sizes"]):
            w = jax.random.normal(next(keys), (k, c_in, f), jnp.float32)
            w = w * (1.0 / math.sqrt(k * c_in))
            b = jax.random.normal(next(keys), (f,), jnp.float32) * 0.1
            self.layers.append(dict(k=k, w=w, b=b, act=True))
            c_in = f
        wf = jax.random.normal(next(keys), (1, c_in, T), jnp.float32)
        wf = wf * (1.0 / math.sqrt(c_in))
        bf = jax.random.normal(next(keys), (T,), jnp.float32) * 0.1
        self.layers.append(dict(k=1, w=wf, b=bf, act=False))
        self.out_dim = T

    # ---- batch-tile choice ---------------------------------------------------
    @staticmethod
    def _choose_batch_tile(B, L, target_rows=256):
        """Pick TB sequences per grid step: ~target_rows rows, sublane-aligned."""
        tb = max(1, min(B, -(-target_rows // L)))
        # If there will be more than one block, the block's sublane extent
        # (tb*L) must be a multiple of 8.  A single full-extent block is exempt.
        while tb < B and (tb * L) % 8 != 0:
            tb += 1
        return min(tb, B)

    # ---- Pallas forward ----------------------------------------------------
    def __call__(self, tokens):
        B, L = tokens.shape
        V, E = self.emb.shape
        T = self.out_dim

        tb = self._choose_batch_tile(B, L)
        n_blocks = -(-B // tb)
        Bp = n_blocks * tb
        rows = tb * L

        tok = tokens.astype(jnp.int32)
        if Bp != B:
            tok = jnp.concatenate(
                [tok, jnp.zeros((Bp - B, L), jnp.int32)], axis=0)
        tok_flat = tok.reshape(Bp * L, 1)
        # Per-row position within its sequence (same for every block).
        pos = jnp.tile(jnp.arange(L, dtype=jnp.int32), tb).reshape(rows, 1)

        layer_meta = tuple(
            (lyr["w"].shape[0], lyr["w"].shape[1], lyr["w"].shape[2], lyr["act"])
            for lyr in self.layers)

        operands = [tok_flat, pos, self.emb]
        in_specs = [
            pl.BlockSpec((rows, 1), lambda g: (g, 0)),
            pl.BlockSpec((rows, 1), lambda g: (0, 0)),
            pl.BlockSpec((V, E), lambda g: (0, 0)),
        ]
        for lyr in self.layers:
            k, c_in, c_out = lyr["w"].shape
            w2 = lyr["w"].reshape(k * c_in, c_out)   # unfolded weight, 1 matmul
            b2 = lyr["b"].reshape(1, c_out)
            operands += [w2, b2]
            in_specs += [
                pl.BlockSpec((k * c_in, c_out), lambda g: (0, 0)),
                pl.BlockSpec((1, c_out), lambda g: (0, 0)),
            ]

        out_flat = pl.pallas_call(
            _make_tokens_to_emb_kernel(L, V, rows, layer_meta,
                                       self.h["conv_activation"]),
            out_shape=jax.ShapeDtypeStruct((Bp * L, T), jnp.float32),
            grid=(n_blocks,),
            in_specs=in_specs,
            out_specs=pl.BlockSpec((rows, T), lambda g: (g, 0)),
            compiler_params=pltpu.CompilerParams(
                dimension_semantics=("parallel",)),
        )(*operands)

        out = out_flat[:B * L].reshape(B, L, T)
        # torch: embedding_out.squeeze(1) — drops the seq dim only when it is 1.
        if out.shape[1] == 1:
            out = out[:, 0, :]
        return out

    # ---- Pure-JAX reference (mirrors the PyTorch graph op-by-op) ------------
    def reference(self, tokens):
        act_name = self.h["conv_activation"]

        def ref_act(x):
            if act_name == "relu":
                return jnp.maximum(x, 0.0)
            if act_name == "gelu":
                return 0.5 * x * (1.0 + _erf_exact(x / math.sqrt(2.0)))
            return jax.nn.sigmoid(x)

        cur = self.emb[tokens].astype(jnp.float32)                # (B, L, E)
        for lyr in self.layers:
            k, w, b = lyr["k"], lyr["w"], lyr["b"]
            B, L, c_in = cur.shape
            if k > 1:
                xp = jnp.concatenate(
                    [cur, jnp.zeros((B, k - 1, c_in), jnp.float32)], axis=1)
            else:
                xp = cur
            acc = jnp.zeros((B, L, w.shape[2]), jnp.float32) + b
            for j in range(k):
                acc = acc + jnp.einsum("blc,co->blo", xp[:, j:j + L, :], w[j])
            cur = ref_act(acc) if lyr["act"] else acc
        if cur.shape[1] == 1:
            cur = cur[:, 0, :]
        return cur


if __name__ == "__main__":
    key = jax.random.PRNGKey(0)
    k_tok, k_par = jax.random.split(key)

    h = {
        "char_vocab_size": 32,
        "char_embedding_size": 16,
        "seg1_type": "conv",
        "conv_activation": "gelu",
        "seg1.kernel|filter_sizes": [(3, 16), (3, 16)],
        "seg2.kernel|filter_sizes": [(3, 32)],
        "token_embedding_size": 32,
    }
    B, L = 2, 8
    tokens = jax.random.randint(k_tok, (B, L), 0, h["char_vocab_size"],
                                dtype=jnp.int32)

    model = TokensToEmb(h, k_par)
    out = model(tokens)
    jax.block_until_ready(out)

    ref = model.reference(tokens)
    assert out.shape == ref.shape == (B, L, h["token_embedding_size"])
    max_err = float(jnp.max(jnp.abs(out - ref)))
    assert jnp.allclose(out, ref, atol=1e-4, rtol=1e-4), max_err

    print("KERNEL_OK")
</pallas_src>

<mosaic_0001>
module attributes {stable_mosaic.version = 11 : i64} {
  func.func @kernel(%arg0: i32, %arg1: memref<16x1xi32, #tpu.memory_space<vmem>>, %arg2: memref<16x1xi32, #tpu.memory_space<vmem>>, %arg3: memref<32x16xf32, #tpu.memory_space<vmem>>, %arg4: memref<48x16xf32, #tpu.memory_space<vmem>>, %arg5: memref<1x16xf32, #tpu.memory_space<vmem>>, %arg6: memref<48x16xf32, #tpu.memory_space<vmem>>, %arg7: memref<1x16xf32, #tpu.memory_space<vmem>>, %arg8: memref<48x32xf32, #tpu.memory_space<vmem>>, %arg9: memref<1x32xf32, #tpu.memory_space<vmem>>, %arg10: memref<32x32xf32, #tpu.memory_space<vmem>>, %arg11: memref<1x32xf32, #tpu.memory_space<vmem>>, %arg12: memref<16x32xf32, #tpu.memory_space<vmem>>) attributes {dimension_semantics = [#tpu.dimension_semantics<parallel>], iteration_bounds = array<i64: 1>, scalar_prefetch = 0 : i64, scratch_operands = 0 : i64, tpu.core_type = #tpu.core_type<tc>, window_params = [{transform_indices = @transform_0, window_bounds = array<i64: 16, 1>}, {pipeline_mode = #tpu.pipeline_mode<synchronous>, transform_indices = @transform_1, window_bounds = array<i64: 16, 1>}, {pipeline_mode = #tpu.pipeline_mode<synchronous>, transform_indices = @transform_2, window_bounds = array<i64: 32, 16>}, {pipeline_mode = #tpu.pipeline_mode<synchronous>, transform_indices = @transform_3, window_bounds = array<i64: 48, 16>}, {pipeline_mode = #tpu.pipeline_mode<synchronous>, transform_indices = @transform_4, window_bounds = array<i64: 1, 16>}, {pipeline_mode = #tpu.pipeline_mode<synchronous>, transform_indices = @transform_5, window_bounds = array<i64: 48, 16>}, {pipeline_mode = #tpu.pipeline_mode<synchronous>, transform_indices = @transform_6, window_bounds = array<i64: 1, 16>}, {pipeline_mode = #tpu.pipeline_mode<synchronous>, transform_indices = @transform_7, window_bounds = array<i64: 48, 32>}, {pipeline_mode = #tpu.pipeline_mode<synchronous>, transform_indices = @transform_8, window_bounds = array<i64: 1, 32>}, {pipeline_mode = #tpu.pipeline_mode<synchronous>, transform_indices = @transform_9, window_bounds = array<i64: 32, 32>}, {pipeline_mode = #tpu.pipeline_mode<synchronous>, transform_indices = @transform_10, window_bounds = array<i64: 1, 32>}, {transform_indices = @transform_11, window_bounds = array<i64: 16, 32>}]} {
    %c0 = arith.constant 0 : index
    %c0_0 = arith.constant 0 : index
    %0 = vector.load %arg1[%c0, %c0_0] : memref<16x1xi32, #tpu.memory_space<vmem>>, vector<16x1xi32>
    %c0_1 = arith.constant 0 : index
    %c0_2 = arith.constant 0 : index
    %1 = vector.load %arg2[%c0_1, %c0_2] : memref<16x1xi32, #tpu.memory_space<vmem>>, vector<16x1xi32>
    %2 = tpu.iota {dimensions = array<i32: 1>} : vector<16x32xi32>
    %3 = vector.broadcast %0 : vector<16x1xi32> to vector<16x32xi32>
    %4 = arith.cmpi eq, %2, %3 : vector<16x32xi32>
    %cst = arith.constant 1.000000e+00 : f32
    %cst_3 = arith.constant 0.000000e+00 : f32
    %5 = vector.broadcast %cst : f32 to vector<16x32xf32>
    %6 = vector.broadcast %cst_3 : f32 to vector<16x32xf32>
    %7 = arith.select %4, %5, %6 : vector<16x32xi1>, vector<16x32xf32>
    %c0_4 = arith.constant 0 : index
    %c0_5 = arith.constant 0 : index
    %8 = vector.load %arg3[%c0_4, %c0_5] : memref<32x16xf32, #tpu.memory_space<vmem>>, vector<32x16xf32>
    %cst_6 = arith.constant dense<0.000000e+00> : vector<16x16xf32>
    %9 = tpu.matmul %7, %8, %cst_6 {dimension_numbers = #tpu.dot_dimension_numbers<[1], [0], [0], [1], [0, 0, 1, 1], [], []>} : vector<16x32xf32>, vector<32x16xf32>, vector<16x16xf32> -> vector<16x16xf32>
    %c0_7 = arith.constant 0 : index
    %c0_8 = arith.constant 0 : index
    %10 = vector.load %arg4[%c0_7, %c0_8] : memref<48x16xf32, #tpu.memory_space<vmem>>, vector<48x16xf32>
    %c0_9 = arith.constant 0 : index
    %c0_10 = arith.constant 0 : index
    %11 = vector.load %arg5[%c0_9, %c0_10] : memref<1x16xf32, #tpu.memory_space<vmem>>, vector<1x16xf32>
    %cst_11 = arith.constant 0.000000e+00 : f32
    %12 = vector.broadcast %cst_11 : f32 to vector<2x16xf32>
    %13 = tpu.concatenate %9, %12 in 0 : vector<16x16xf32>, vector<2x16xf32> -> vector<18x16xf32>
    %14 = vector.extract_strided_slice %13 {offsets = [0, 0], sizes = [16, 16], strides = [1, 1]} : vector<18x16xf32> to vector<16x16xf32>
    %15 = vector.extract_strided_slice %13 {offsets = [1, 0], sizes = [16, 16], strides = [1, 1]} : vector<18x16xf32> to vector<16x16xf32>
    %c7_i32 = arith.constant 7 : i32
    %16 = vector.broadcast %c7_i32 : i32 to vector<16x1xi32>
    %17 = arith.cmpi slt, %1, %16 : vector<16x1xi32>
    %18 = arith.extui %17 : vector<16x1xi1> to vector<16x1xi32>
    %19 = arith.sitofp %18 : vector<16x1xi32> to vector<16x1xf32>
    %20 = vector.broadcast %19 : vector<16x1xf32> to vector<16x16xf32>
    %21 = arith.mulf %15, %20 : vector<16x16xf32>
    %22 = vector.extract_strided_slice %13 {offsets = [2, 0], sizes = [16, 16], strides = [1, 1]} : vector<18x16xf32> to vector<16x16xf32>
    %c6_i32 = arith.constant 6 : i32
    %23 = vector.broadcast %c6_i32 : i32 to vector<16x1xi32>
    %24 = arith.cmpi slt, %1, %23 : vector<16x1xi32>
    %25 = arith.extui %24 : vector<16x1xi1> to vector<16x1xi32>
    %26 = arith.sitofp %25 : vector<16x1xi32> to vector<16x1xf32>
    %27 = vector.broadcast %26 : vector<16x1xf32> to vector<16x16xf32>
    %28 = arith.mulf %22, %27 : vector<16x16xf32>
    %29 = tpu.concatenate %14, %21, %28 in 1 : vector<16x16xf32>, vector<16x16xf32>, vector<16x16xf32> -> vector<16x48xf32>
    %cst_12 = arith.constant dense<0.000000e+00> : vector<16x16xf32>
    %30 = tpu.matmul %29, %10, %cst_12 {dimension_numbers = #tpu.dot_dimension_numbers<[1], [0], [0], [1], [0, 0, 1, 1], [], []>} : vector<16x48xf32>, vector<48x16xf32>, vector<16x16xf32> -> vector<16x16xf32>
    %31 = vector.broadcast %11 : vector<1x16xf32> to vector<16x16xf32>
    %32 = arith.addf %30, %31 : vector<16x16xf32>
    %cst_13 = arith.constant 5.000000e-01 : f32
    %33 = vector.broadcast %cst_13 : f32 to vector<16x16xf32>
    %34 = arith.mulf %33, %32 : vector<16x16xf32>
    %cst_14 = arith.constant 0.707106769 : f32
    %35 = vector.broadcast %cst_14 : f32 to vector<16x16xf32>
    %36 = arith.mulf %32, %35 : vector<16x16xf32>
    %37 = math.absf %36 : vector<16x16xf32>
    %cst_15 = arith.constant 0.327591091 : f32
    %38 = vector.broadcast %cst_15 : f32 to vector<16x16xf32>
    %39 = arith.mulf %38, %37 : vector<16x16xf32>
    %cst_16 = arith.constant 1.000000e+00 : f32
    %40 = vector.broadcast %cst_16 : f32 to vector<16x16xf32>
    %41 = arith.addf %40, %39 : vector<16x16xf32>
    %cst_17 = arith.constant 1.000000e+00 : f32
    %42 = vector.broadcast %cst_17 : f32 to vector<16x16xf32>
    %43 = arith.divf %42, %41 : vector<16x16xf32>
    %cst_18 = arith.constant 1.06140542 : f32
    %44 = vector.broadcast %cst_18 : f32 to vector<16x16xf32>
    %45 = arith.mulf %44, %43 : vector<16x16xf32>
    %cst_19 = arith.constant -1.45315206 : f32
    %46 = vector.broadcast %cst_19 : f32 to vector<16x16xf32>
    %47 = arith.addf %45, %46 : vector<16x16xf32>
    %48 = arith.mulf %47, %43 : vector<16x16xf32>
    %cst_20 = arith.constant 1.42141378 : f32
    %49 = vector.broadcast %cst_20 : f32 to vector<16x16xf32>
    %50 = arith.addf %48, %49 : vector<16x16xf32>
    %51 = arith.mulf %50, %43 : vector<16x16xf32>
    %cst_21 = arith.constant -0.284496725 : f32
    %52 = vector.broadcast %cst_21 : f32 to vector<16x16xf32>
    %53 = arith.addf %51, %52 : vector<16x16xf32>
    %54 = arith.mulf %53, %43 : vector<16x16xf32>
    %cst_22 = arith.constant 0.254829586 : f32
    %55 = vector.broadcast %cst_22 : f32 to vector<16x16xf32>
    %56 = arith.addf %54, %55 : vector<16x16xf32>
    %57 = arith.mulf %56, %43 : vector<16x16xf32>
    %cst_23 = arith.constant 0.000000e+00 : f32
    %58 = vector.broadcast %cst_23 : f32 to vector<16x16xf32>
    %59 = arith.subf %58, %37 : vector<16x16xf32>
    %60 = arith.mulf %59, %37 : vector<16x16xf32>
    %61 = math.exp %60 : vector<16x16xf32>
    %62 = arith.mulf %57, %61 : vector<16x16xf32>
    %cst_24 = arith.constant 1.000000e+00 : f32
    %63 = vector.broadcast %cst_24 : f32 to vector<16x16xf32>
    %64 = arith.subf %63, %62 : vector<16x16xf32>
    %cst_25 = arith.constant 0.000000e+00 : f32
    %65 = vector.broadcast %cst_25 : f32 to vector<16x16xf32>
    %66 = arith.cmpf oge, %36, %65 : vector<16x16xf32>
    %cst_26 = arith.constant 0.000000e+00 : f32
    %67 = vector.broadcast %cst_26 : f32 to vector<16x16xf32>
    %68 = arith.subf %67, %64 : vector<16x16xf32>
    %69 = arith.select %66, %64, %68 : vector<16x16xi1>, vector<16x16xf32>
    %cst_27 = arith.constant 1.000000e+00 : f32
    %70 = vector.broadcast %cst_27 : f32 to vector<16x16xf32>
    %71 = arith.addf %70, %69 : vector<16x16xf32>
    %72 = arith.mulf %34, %71 : vector<16x16xf32>
    %c0_28 = arith.constant 0 : index
    %c0_29 = arith.constant 0 : index
    %73 = vector.load %arg6[%c0_28, %c0_29] : memref<48x16xf32, #tpu.memory_space<vmem>>, vector<48x16xf32>
    %c0_30 = arith.constant 0 : index
    %c0_31 = arith.constant 0 : index
    %74 = vector.load %arg7[%c0_30, %c0_31] : memref<1x16xf32, #tpu.memory_space<vmem>>, vector<1x16xf32>
    %cst_32 = arith.constant 0.000000e+00 : f32
    %75 = vector.broadcast %cst_32 : f32 to vector<2x16xf32>
    %76 = tpu.concatenate %72, %75 in 0 : vector<16x16xf32>, vector<2x16xf32> -> vector<18x16xf32>
    %77 = vector.extract_strided_slice %76 {offsets = [0, 0], sizes = [16, 16], strides = [1, 1]} : vector<18x16xf32> to vector<16x16xf32>
    %78 = vector.extract_strided_slice %76 {offsets = [1, 0], sizes = [16, 16], strides = [1, 1]} : vector<18x16xf32> to vector<16x16xf32>
    %c7_i32_33 = arith.constant 7 : i32
    %79 = vector.broadcast %c7_i32_33 : i32 to vector<16x1xi32>
    %80 = arith.cmpi slt, %1, %79 : vector<16x1xi32>
    %81 = arith.extui %80 : vector<16x1xi1> to vector<16x1xi32>
    %82 = arith.sitofp %81 : vector<16x1xi32> to vector<16x1xf32>
    %83 = vector.broadcast %82 : vector<16x1xf32> to vector<16x16xf32>
    %84 = arith.mulf %78, %83 : vector<16x16xf32>
    %85 = vector.extract_strided_slice %76 {offsets = [2, 0], sizes = [16, 16], strides = [1, 1]} : vector<18x16xf32> to vector<16x16xf32>
    %c6_i32_34 = arith.constant 6 : i32
    %86 = vector.broadcast %c6_i32_34 : i32 to vector<16x1xi32>
    %87 = arith.cmpi slt, %1, %86 : vector<16x1xi32>
    %88 = arith.extui %87 : vector<16x1xi1> to vector<16x1xi32>
    %89 = arith.sitofp %88 : vector<16x1xi32> to vector<16x1xf32>
    %90 = vector.broadcast %89 : vector<16x1xf32> to vector<16x16xf32>
    %91 = arith.mulf %85, %90 : vector<16x16xf32>
    %92 = tpu.concatenate %77, %84, %91 in 1 : vector<16x16xf32>, vector<16x16xf32>, vector<16x16xf32> -> vector<16x48xf32>
    %cst_35 = arith.constant dense<0.000000e+00> : vector<16x16xf32>
    %93 = tpu.matmul %92, %73, %cst_35 {dimension_numbers = #tpu.dot_dimension_numbers<[1], [0], [0], [1], [0, 0, 1, 1], [], []>} : vector<16x48xf32>, vector<48x16xf32>, vector<16x16xf32> -> vector<16x16xf32>
    %94 = vector.broadcast %74 : vector<1x16xf32> to vector<16x16xf32>
    %95 = arith.addf %93, %94 : vector<16x16xf32>
    %cst_36 = arith.constant 5.000000e-01 : f32
    %96 = vector.broadcast %cst_36 : f32 to vector<16x16xf32>
    %97 = arith.mulf %96, %95 : vector<16x16xf32>
    %cst_37 = arith.constant 0.707106769 : f32
    %98 = vector.broadcast %cst_37 : f32 to vector<16x16xf32>
    %99 = arith.mulf %95, %98 : vector<16x16xf32>
    %100 = math.absf %99 : vector<16x16xf32>
    %cst_38 = arith.constant 0.327591091 : f32
    %101 = vector.broadcast %cst_38 : f32 to vector<16x16xf32>
    %102 = arith.mulf %101, %100 : vector<16x16xf32>
    %cst_39 = arith.constant 1.000000e+00 : f32
    %103 = vector.broadcast %cst_39 : f32 to vector<16x16xf32>
    %104 = arith.addf %103, %102 : vector<16x16xf32>
    %cst_40 = arith.constant 1.000000e+00 : f32
    %105 = vector.broadcast %cst_40 : f32 to vector<16x16xf32>
    %106 = arith.divf %105, %104 : vector<16x16xf32>
    %cst_41 = arith.constant 1.06140542 : f32
    %107 = vector.broadcast %cst_41 : f32 to vector<16x16xf32>
    %108 = arith.mulf %107, %106 : vector<16x16xf32>
    %cst_42 = arith.constant -1.45315206 : f32
    %109 = vector.broadcast %cst_42 : f32 to vector<16x16xf32>
    %110 = arith.addf %108, %109 : vector<16x16xf32>
    %111 = arith.mulf %110, %106 : vector<16x16xf32>
    %cst_43 = arith.constant 1.42141378 : f32
    %112 = vector.broadcast %cst_43 : f32 to vector<16x16xf32>
    %113 = arith.addf %111, %112 : vector<16x16xf32>
    %114 = arith.mulf %113, %106 : vector<16x16xf32>
    %cst_44 = arith.constant -0.284496725 : f32
    %115 = vector.broadcast %cst_44 : f32 to vector<16x16xf32>
    %116 = arith.addf %114, %115 : vector<16x16xf32>
    %117 = arith.mulf %116, %106 : vector<16x16xf32>
    %cst_45 = arith.constant 0.254829586 : f32
    %118 = vector.broadcast %cst_45 : f32 to vector<16x16xf32>
    %119 = arith.addf %117, %118 : vector<16x16xf32>
    %120 = arith.mulf %119, %106 : vector<16x16xf32>
    %cst_46 = arith.constant 0.000000e+00 : f32
    %121 = vector.broadcast %cst_46 : f32 to vector<16x16xf32>
    %122 = arith.subf %121, %100 : vector<16x16xf32>
    %123 = arith.mulf %122, %100 : vector<16x16xf32>
    %124 = math.exp %123 : vector<16x16xf32>
    %125 = arith.mulf %120, %124 : vector<16x16xf32>
    %cst_47 = arith.constant 1.000000e+00 : f32
    %126 = vector.broadcast %cst_47 : f32 to vector<16x16xf32>
    %127 = arith.subf %126, %125 : vector<16x16xf32>
    %cst_48 = arith.constant 0.000000e+00 : f32
    %128 = vector.broadcast %cst_48 : f32 to vector<16x16xf32>
    %129 = arith.cmpf oge, %99, %128 : vector<16x16xf32>
    %cst_49 = arith.constant 0.000000e+00 : f32
    %130 = vector.broadcast %cst_49 : f32 to vector<16x16xf32>
    %131 = arith.subf %130, %127 : vector<16x16xf32>
    %132 = arith.select %129, %127, %131 : vector<16x16xi1>, vector<16x16xf32>
    %cst_50 = arith.constant 1.000000e+00 : f32
    %133 = vector.broadcast %cst_50 : f32 to vector<16x16xf32>
    %134 = arith.addf %133, %132 : vector<16x16xf32>
    %135 = arith.mulf %97, %134 : vector<16x16xf32>
    %c0_51 = arith.constant 0 : index
    %c0_52 = arith.constant 0 : index
    %136 = vector.load %arg8[%c0_51, %c0_52] : memref<48x32xf32, #tpu.memory_space<vmem>>, vector<48x32xf32>
    %c0_53 = arith.constant 0 : index
    %c0_54 = arith.constant 0 : index
    %137 = vector.load %arg9[%c0_53, %c0_54] : memref<1x32xf32, #tpu.memory_space<vmem>>, vector<1x32xf32>
    %cst_55 = arith.constant 0.000000e+00 : f32
    %138 = vector.broadcast %cst_55 : f32 to vector<2x16xf32>
    %139 = tpu.concatenate %135, %138 in 0 : vector<16x16xf32>, vector<2x16xf32> -> vector<18x16xf32>
    %140 = vector.extract_strided_slice %139 {offsets = [0, 0], sizes = [16, 16], strides = [1, 1]} : vector<18x16xf32> to vector<16x16xf32>
    %141 = vector.extract_strided_slice %139 {offsets = [1, 0], sizes = [16, 16], strides = [1, 1]} : vector<18x16xf32> to vector<16x16xf32>
    %c7_i32_56 = arith.constant 7 : i32
    %142 = vector.broadcast %c7_i32_56 : i32 to vector<16x1xi32>
    %143 = arith.cmpi slt, %1, %142 : vector<16x1xi32>
    %144 = arith.extui %143 : vector<16x1xi1> to vector<16x1xi32>
    %145 = arith.sitofp %144 : vector<16x1xi32> to vector<16x1xf32>
    %146 = vector.broadcast %145 : vector<16x1xf32> to vector<16x16xf32>
    %147 = arith.mulf %141, %146 : vector<16x16xf32>
    %148 = vector.extract_strided_slice %139 {offsets = [2, 0], sizes = [16, 16], strides = [1, 1]} : vector<18x16xf32> to vector<16x16xf32>
    %c6_i32_57 = arith.constant 6 : i32
    %149 = vector.broadcast %c6_i32_57 : i32 to vector<16x1xi32>
    %150 = arith.cmpi slt, %1, %149 : vector<16x1xi32>
    %151 = arith.extui %150 : vector<16x1xi1> to vector<16x1xi32>
    %152 = arith.sitofp %151 : vector<16x1xi32> to vector<16x1xf32>
    %153 = vector.broadcast %152 : vector<16x1xf32> to vector<16x16xf32>
    %154 = arith.mulf %148, %153 : vector<16x16xf32>
    %155 = tpu.concatenate %140, %147, %154 in 1 : vector<16x16xf32>, vector<16x16xf32>, vector<16x16xf32> -> vector<16x48xf32>
    %cst_58 = arith.constant dense<0.000000e+00> : vector<16x32xf32>
    %156 = tpu.matmul %155, %136, %cst_58 {dimension_numbers = #tpu.dot_dimension_numbers<[1], [0], [0], [1], [0, 0, 1, 1], [], []>} : vector<16x48xf32>, vector<48x32xf32>, vector<16x32xf32> -> vector<16x32xf32>
    %157 = vector.broadcast %137 : vector<1x32xf32> to vector<16x32xf32>
    %158 = arith.addf %156, %157 : vector<16x32xf32>
    %cst_59 = arith.constant 5.000000e-01 : f32
    %159 = vector.broadcast %cst_59 : f32 to vector<16x32xf32>
    %160 = arith.mulf %159, %158 : vector<16x32xf32>
    %cst_60 = arith.constant 0.707106769 : f32
    %161 = vector.broadcast %cst_60 : f32 to vector<16x32xf32>
    %162 = arith.mulf %158, %161 : vector<16x32xf32>
    %163 = math.absf %162 : vector<16x32xf32>
    %cst_61 = arith.constant 0.327591091 : f32
    %164 = vector.broadcast %cst_61 : f32 to vector<16x32xf32>
    %165 = arith.mulf %164, %163 : vector<16x32xf32>
    %cst_62 = arith.constant 1.000000e+00 : f32
    %166 = vector.broadcast %cst_62 : f32 to vector<16x32xf32>
    %167 = arith.addf %166, %165 : vector<16x32xf32>
    %cst_63 = arith.constant 1.000000e+00 : f32
    %168 = vector.broadcast %cst_63 : f32 to vector<16x32xf32>
    %169 = arith.divf %168, %167 : vector<16x32xf32>
    %cst_64 = arith.constant 1.06140542 : f32
    %170 = vector.broadcast %cst_64 : f32 to vector<16x32xf32>
    %171 = arith.mulf %170, %169 : vector<16x32xf32>
    %cst_65 = arith.constant -1.45315206 : f32
    %172 = vector.broadcast %cst_65 : f32 to vector<16x32xf32>
    %173 = arith.addf %171, %172 : vector<16x32xf32>
    %174 = arith.mulf %173, %169 : vector<16x32xf32>
    %cst_66 = arith.constant 1.42141378 : f32
    %175 = vector.broadcast %cst_66 : f32 to vector<16x32xf32>
    %176 = arith.addf %174, %175 : vector<16x32xf32>
    %177 = arith.mulf %176, %169 : vector<16x32xf32>
    %cst_67 = arith.constant -0.284496725 : f32
    %178 = vector.broadcast %cst_67 : f32 to vector<16x32xf32>
    %179 = arith.addf %177, %178 : vector<16x32xf32>
    %180 = arith.mulf %179, %169 : vector<16x32xf32>
    %cst_68 = arith.constant 0.254829586 : f32
    %181 = vector.broadcast %cst_68 : f32 to vector<16x32xf32>
    %182 = arith.addf %180, %181 : vector<16x32xf32>
    %183 = arith.mulf %182, %169 : vector<16x32xf32>
    %cst_69 = arith.constant 0.000000e+00 : f32
    %184 = vector.broadcast %cst_69 : f32 to vector<16x32xf32>
    %185 = arith.subf %184, %163 : vector<16x32xf32>
    %186 = arith.mulf %185, %163 : vector<16x32xf32>
    %187 = math.exp %186 : vector<16x32xf32>
    %188 = arith.mulf %183, %187 : vector<16x32xf32>
    %cst_70 = arith.constant 1.000000e+00 : f32
    %189 = vector.broadcast %cst_70 : f32 to vector<16x32xf32>
    %190 = arith.subf %189, %188 : vector<16x32xf32>
    %cst_71 = arith.constant 0.000000e+00 : f32
    %191 = vector.broadcast %cst_71 : f32 to vector<16x32xf32>
    %192 = arith.cmpf oge, %162, %191 : vector<16x32xf32>
    %cst_72 = arith.constant 0.000000e+00 : f32
    %193 = vector.broadcast %cst_72 : f32 to vector<16x32xf32>
    %194 = arith.subf %193, %190 : vector<16x32xf32>
    %195 = arith.select %192, %190, %194 : vector<16x32xi1>, vector<16x32xf32>
    %cst_73 = arith.constant 1.000000e+00 : f32
    %196 = vector.broadcast %cst_73 : f32 to vector<16x32xf32>
    %197 = arith.addf %196, %195 : vector<16x32xf32>
    %198 = arith.mulf %160, %197 : vector<16x32xf32>
    %c0_74 = arith.constant 0 : index
    %c0_75 = arith.constant 0 : index
    %199 = vector.load %arg10[%c0_74, %c0_75] : memref<32x32xf32, #tpu.memory_space<vmem>>, vector<32x32xf32>
    %c0_76 = arith.constant 0 : index
    %c0_77 = arith.constant 0 : index
    %200 = vector.load %arg11[%c0_76, %c0_77] : memref<1x32xf32, #tpu.memory_space<vmem>>, vector<1x32xf32>
    %cst_78 = arith.constant dense<0.000000e+00> : vector<16x32xf32>
    %201 = tpu.matmul %198, %199, %cst_78 {dimension_numbers = #tpu.dot_dimension_numbers<[1], [0], [0], [1], [0, 0, 1, 1], [], []>} : vector<16x32xf32>, vector<32x32xf32>, vector<16x32xf32> -> vector<16x32xf32>
    %202 = vector.broadcast %200 : vector<1x32xf32> to vector<16x32xf32>
    %203 = arith.addf %201, %202 : vector<16x32xf32>
    %c0_79 = arith.constant 0 : index
    %c0_80 = arith.constant 0 : index
    %204 = vector.load %arg12[%c0_79, %c0_80] : memref<16x32xf32, #tpu.memory_space<vmem>>, vector<16x32xf32>
    tpu.vector_store %arg12[%c0_79, %c0_80], %203 {strides = array<i32>} : memref<16x32xf32, #tpu.memory_space<vmem>>, vector<16x32xf32>,
    return
  }
  func.func @transform_0(%arg0: i32) -> (i32, i32) {
    %c0_i32 = arith.constant 0 : i32
    %c0_i32_0 = arith.constant 0 : i32
    return %arg0, %c0_i32 : i32, i32
  }
  func.func @transform_1(%arg0: i32) -> (i32, i32) {
    %c0_i32 = arith.constant 0 : i32
    %c0_i32_0 = arith.constant 0 : i32
    %c0_i32_1 = arith.constant 0 : i32
    return %c0_i32, %c0_i32_0 : i32, i32
  }
  func.func @transform_2(%arg0: i32) -> (i32, i32) {
    %c0_i32 = arith.constant 0 : i32
    %c0_i32_0 = arith.constant 0 : i32
    %c0_i32_1 = arith.constant 0 : i32
    return %c0_i32, %c0_i32_0 : i32, i32
  }
  func.func @transform_3(%arg0: i32) -> (i32, i32) {
    %c0_i32 = arith.constant 0 : i32
    %c0_i32_0 = arith.constant 0 : i32
    %c0_i32_1 = arith.constant 0 : i32
    return %c0_i32, %c0_i32_0 : i32, i32
  }
  func.func @transform_4(%arg0: i32) -> (i32, i32) {
    %c0_i32 = arith.constant 0 : i32
    %c0_i32_0 = arith.constant 0 : i32
    %c0_i32_1 = arith.constant 0 : i32
    return %c0_i32, %c0_i32_0 : i32, i32
  }
  func.func @transform_5(%arg0: i32) -> (i32, i32) {
    %c0_i32 = arith.constant 0 : i32
    %c0_i32_0 = arith.constant 0 : i32
    %c0_i32_1 = arith.constant 0 : i32
    return %c0_i32, %c0_i32_0 : i32, i32
  }
  func.func @transform_6(%arg0: i32) -> (i32, i32) {
    %c0_i32 = arith.constant 0 : i32
    %c0_i32_0 = arith.constant 0 : i32
    %c0_i32_1 = arith.constant 0 : i32
    return %c0_i32, %c0_i32_0 : i32, i32
  }
  func.func @transform_7(%arg0: i32) -> (i32, i32) {
    %c0_i32 = arith.constant 0 : i32
    %c0_i32_0 = arith.constant 0 : i32
    %c0_i32_1 = arith.constant 0 : i32
    return %c0_i32, %c0_i32_0 : i32, i32
  }
  func.func @transform_8(%arg0: i32) -> (i32, i32) {
    %c0_i32 = arith.constant 0 : i32
    %c0_i32_0 = arith.constant 0 : i32
    %c0_i32_1 = arith.constant 0 : i32
    return %c0_i32, %c0_i32_0 : i32, i32
  }
  func.func @transform_9(%arg0: i32) -> (i32, i32) {
    %c0_i32 = arith.constant 0 : i32
    %c0_i32_0 = arith.constant 0 : i32
    %c0_i32_1 = arith.constant 0 : i32
    return %c0_i32, %c0_i32_0 : i32, i32
  }
  func.func @transform_10(%arg0: i32) -> (i32, i32) {
    %c0_i32 = arith.constant 0 : i32
    %c0_i32_0 = arith.constant 0 : i32
    %c0_i32_1 = arith.constant 0 : i32
    return %c0_i32, %c0_i32_0 : i32, i32
  }
  func.func @transform_11(%arg0: i32) -> (i32, i32) {
    %c0_i32 = arith.constant 0 : i32
    %c0_i32_0 = arith.constant 0 : i32
    return %arg0, %c0_i32 : i32, i32
  }
}

</mosaic_0001>

<bundles_post_ra>
// kernel: tpu_custom_call.1
= control target key start
LH: loop header
LB: loop body
LE: loop exit
PB: predicated region body
PF: predicated region fallthrough
CT: control target
= control target key end

     0   :  { %v1083_v2 = vmov 0   ;;  %s1344_s0 = inlined_call_operand.vmem [shape: s32[16,1], index: 0, kind: input, shape index: {}]   ;;  %s1345_s1 = inlined_call_operand.vmem [shape: s32[16,1], index: 1, kind: input, shape index: {}]   ;;  %s1346_s2 = inlined_call_operand.vmem [shape: f32[32,16], index: 2, kind: input, shape index: {}]   ;;  %s1347_s3 = inlined_call_operand.vmem [shape: f32[48,16], index: 3, kind: input, shape index: {}]   ;;  %s1348_s4 = inlined_call_operand.vmem [shape: f32[1,16], index: 4, kind: input, shape index: {}]   ;;  %s1349_s5 = inlined_call_operand.vmem [shape: f32[48,16], index: 5, kind: input, shape index: {}]   ;;  %s1350_s6 = inlined_call_operand.vmem [shape: f32[1,16], index: 6, kind: input, shape index: {}]   ;;  %s1351_s7 = inlined_call_operand.vmem [shape: f32[48,32], index: 7, kind: input, shape index: {}]   ;;  %s1352_s8 = inlined_call_operand.vmem [shape: f32[1,32], index: 8, kind: input, shape index: {}]   ;;  %s1353_s9 = inlined_call_operand.vmem [shape: f32[32,32], index: 9, kind: input, shape index: {}]   ;;  %s1354_s10 = inlined_call_operand.vmem [shape: f32[1,32], index: 10, kind: input, shape index: {}]   ;;  %s1355_s11 = inlined_call_operand.hbm [shape: f32[16,32], index: 11, kind: output, shape index: {}]  }
   0x1   :  { %v39_v0 = vld [vmem:[%s1344_s0] sm:$0xff]  ;;  %1023 = vset.pattern.permute.xlu0 %v1083_v2  ;;  %v56_v3 = vld [vmem:[%s1346_s2 + $0x8] sm:$0xff]  ;;  %v57_v4 = vld [vmem:[%s1346_s2 + $0x10] sm:$0xff]  ;;  %1024 = vset.pattern.permute.xlu1 %v1083_v2 }
   0x2   :  { %v55_v1 = vld [vmem:[%s1346_s2] sm:$0xff]  ;;  %v58_v5 = vld [vmem:[%s1346_s2 + $0x18] sm:$0xff]  ;;  %46 = vperm.xlu0 %1023, %v39_v0  }
   0x3   :  { %v964_v6 = vpack.c.bf16 %v56_v3, %v55_v1  ;;  %v968_v7 = vpack.c.bf16 %v58_v5, %v57_v4 }
   0x4   :  { %16 = vsyncpa [#allocation3], 0  ;;  %v40_v8 = vld [vmem:[%s1344_s0 + $0x8] sm:$0xff]  ;;  %v41_v9 = vld [vmem:[%s1345_s1] sm:$0xff]  ;;  %v1084_v11 = vmov 0.0   ;;  %v43_v18 = vlaneseq  ;;  %vm59_vm4 = vcmask 261120  }
   0x5   :  { %965 = vmatprep.subr.bf16.mxu0 %v964_v6  ;;  %v42_v10 = vld [vmem:[%s1345_s1 + $0x8] sm:$0xff]  ;;  %vm148_vm0 = vcmp.lt.s32.totalorder %v41_v9, 7  ;;  %vm172_vm2 = vcmp.lt.s32.totalorder %v41_v9, 6  ;;  %v141_v24 = vld [vmem:[%s1347_s3] sm:$0xff]  ;;  %v143_v26 = vld [vmem:[%s1347_s3 + $0x10] sm:$0xff]  ;;  %vm162_vm7 = vcmask 1040384  }
   0x6   :  { %967 = vmatpush3.bf16.msra.mxu0 %v964_v6  ;;  %49 = vperm.xlu0 %1023, %v40_v8   ;;  %vm149_vm1 = vcmp.lt.s32.totalorder %v42_v10, 7  ;;  %vm173_vm3 = vcmp.lt.s32.totalorder %v42_v10, 6  ;;  %v845_v12 = vsel %vm148_vm0, 1.0, %v1084_v11  ;;  %v847_v14 = vsel %vm172_vm2, 1.0, %v1084_v11  ;;  %v142_v25 = vld [vmem:[%s1347_s3 + $0x8] sm:$0xff]  ;;  %v144_v28 = vld [vmem:[%s1347_s3 + $0x18] sm:$0xff] }
   0x7   :  { %969 = vmatprep.subr.bf16.mxu0 %v968_v7  ;;  %v846_v13 = vsel %vm149_vm1, 1.0, %v1084_v11  ;;  %v848_v15 = vsel %vm173_vm3, 1.0, %v1084_v11  ;;  %v44_v19 = vand.u32 127, %v43_v18  ;;  %v972_v27 = vpack.c.bf16 %v142_v25, %v141_v24  ;;  %v145_v37 = vld [vmem:[%s1347_s3 + $0x20] sm:$0xff]  ;;  %v146_v38 = vld [vmem:[%s1347_s3 + $0x28] sm:$0xff]  ;;  %s1085_s3 = smov 16  }
   0x8   :  { %v1025_v16 = vpack.i.bf16 %v846_v13, %v845_v12  ;;  %v1030_v17 = vpack.i.bf16 %v848_v15, %v847_v14  ;;  %v976_v29 = vpack.c.bf16 %v144_v28, %v143_v26  ;;  %v980_v42 = vpack.c.bf16 %v146_v38, %v145_v37  ;;  %s1086_s23 = smov 32   ;;  %v374_v8 = vld [vmem:[%s1349_s5 + $0x8] sm:$0xff]  ;;  %v375_v9 = vld [vmem:[%s1349_s5 + $0x10] sm:$0xff]  ;;  %v849_v13 = vld [vmem:[%s1348_s4] ss:$0 sm:$0xff]  ;;  %s1087_s1 = smov [#allocation2]  }
   0x9   :  { %973 = vmatprep.subr.bf16.mxu1 %v972_v27  ;;  %vm186_vm8 = vcmask 1041408   ;;  %vm199_vm9 = vcmask 1046528   ;;  %vm214_vm10 = vcmask 1045504   ;;  %vm226_vm11 = vcmask 130048   ;;  %s832_s2 = sshll.u32 %s1087_s1, 4  ;;  %s833_s2 = int_to_ptr.vmem [resolvable:$true] %s832_s2 }
   0xa   :  { %971 = vmatpush3.bf16.msra.mxu0 %v968_v7  ;;  %1026 = vperm.xlu1 %1024, %v1025_v16   ;;  %vm237_vm12 = vcmask 392192   ;;  %v373_v7 = vld [vmem:[%s1349_s5] sm:$0xff]  ;;  %s1059_s14 = scalar_lea.vmem %s833_s2, 256  ;;  %p1064_p1 = scmp.lt.s32.totalorder %s833_s2, %s833_s2 }
   0xb   :  { %975 = vmatpush3.bf16.msra.mxu1 %v972_v27  ;;  %v984_v10 = vpack.c.bf16 %v374_v8, %v373_v7  ;;  %p1060_p0 = scmp.ne.s32.totalorder %s833_s2, %s1059_s14  ;;  %p1065_p2 = scmp.lt.s32.totalorder %s1059_s14, %s1059_s14 }
   0xc   :  { %977 = vmatprep.subr.bf16.mxu1 %v976_v29 }
   0xd   :  { %985 = vmatprep.subr.bf16.mxu0 %v984_v10  ;;  %p1066_p3 = por %p1065_p2, %p1064_p1 }
   0xe   :  { %1031 = vperm.xlu1 %1024, %v1030_v17  }
   0xf   :  { %979 = vmatpush3.bf16.msra.mxu1 %v976_v29  ;;  %p1067_p4 = pnand %p1066_p3, %p1060_p0 }
  0x10   :  { %981 = vmatprep.subr.bf16.mxu1 %v980_v42 }
  0x13   :  { %983 = vmatpush3.bf16.msra.mxu1 %v980_v42 }
  0x81   :  { %v47_v20 = vpop.permute.xlu0 %46 }
  0x82   :  { %vm51_vm5 = vcmp.eq.s32.totalorder %v44_v19, %v47_v20 }
  0x83   :  { %v53_v21 = vsel %vm51_vm5, 1.0, %v1084_v11 }
  0x84   :  { %905 = vmatprep.mubr.msk.f32.mxu0 %vm59_vm4, %v53_v21 }
  0x85   :  { %v50_v22 = vpop.permute.xlu0 %49 }
  0x86   :  { %vm52_vm6 = vcmp.eq.s32.totalorder %v44_v19, %v50_v22 }
  0x87   :  { %v54_v23 = vsel %vm52_vm6, 1.0, %v1084_v11  ;;  %v376_v11 = vld [vmem:[%s1349_s5 + $0x18] sm:$0xff] }
  0x88   :  { %906 = vmatmul.mubr.msk.f32.vlgmr.msra.gmra.mrb[0].mxu0 %vm59_vm4, %v54_v23  ;;  %v988_v12 = vpack.c.bf16 %v376_v11, %v375_v9 }
  0x89   :  { %v1027_v30 = vpop.permute.xlu1 %1026  ;;  %987 = vmatpush3.bf16.msra.mxu0 %v984_v10 }
  0x8a   :  { %v1029_v32 = vunpack.i.h.bf16 %v1027_v30  ;;  %v1028_v33 = vunpack.i.l.bf16 %v1027_v30  ;;  %989 = vmatprep.subr.bf16.mxu0 %v988_v12 }
  0x8c   :  { %v164_v36 = vrot.slane %v1029_v32, 7  ;;  %v1194_v39 = vrot.slane %v1028_v33, 7 }
  0x8d   :  { %v1032_v31 = vpop.permute.xlu1 %1031  ;;  %991 = vmatpush3.bf16.msra.mxu0 %v988_v12 }
  0x8e   :  { %v1034_v34 = vunpack.i.h.bf16 %v1032_v31  ;;  %v1033_v35 = vunpack.i.l.bf16 %v1032_v31  ;;  %v171_v43 = vmul.f32 0.0, %v164_v36  ;;  %v1199_v44 = vsel %vm162_vm7, %v1194_v39, %v164_v36 }
  0x90   :  { %v188_v40 = vrot.slane %v1034_v34, 6  ;;  %v1196_v41 = vrot.slane %v1033_v35, 6  ;;  %v1204_v47 = vrot.slane %v171_v43, 1 }
  0x92   :  { %v1202_v45 = vsel %vm186_vm8, %v1196_v41, %v188_v40  ;;  %v195_v48 = vmul.f32 0.0, %v188_v40 }
  0x94   :  { %v1210_v58 = vrot.slane %v195_v48, 2 }
 0x15b   :  { %v907_v46 = vpop.f32.mrb[0].mxu0 }
 0x15c   :  { %v170_v49 = vmul.f32 %v907_v46, %v1199_v44  ;;  %v194_v50 = vmul.f32 %v907_v46, %v1202_v45  ;;  %v132_v51 = vpop.f32.mrb[1].mxu0 }
 0x15d   :  { %v169_v52 = vmul.f32 %v1194_v39, %v132_v51  ;;  %v193_v53 = vmul.f32 %v1196_v41, %v132_v51 }
 0x15e   :  { %v201_v54 = vrot.slane %v170_v49, 1  ;;  %v216_v55 = vrot.slane %v194_v50, 2 }
 0x15f   :  { %v200_v56 = vrot.slane %v169_v52, 1  ;;  %v215_v57 = vrot.slane %v193_v53, 2 }
 0x160   :  { %v204_v59 = vsel %vm199_vm9, %v201_v54, %v1204_v47  ;;  %v219_v62 = vsel %vm214_vm10, %v216_v55, %v1210_v58 }
 0x161   :  { %207 = vrot.lane.b32.xlu1 %v204_v59, %s1085_s3  ;;  %v202_v60 = vsel %vm199_vm9, %v200_v56, %v201_v54  ;;  %v217_v61 = vsel %vm214_vm10, %v215_v57, %v216_v55 }
 0x162   :  { %205 = vrot.lane.b32.xlu0 %v202_v60, %s1085_s3 }
 0x165   :  { %222 = vrot.lane.b32.xlu1 %v219_v62, %s1086_s23 }
 0x166   :  { %220 = vrot.lane.b32.xlu0 %v217_v61, %s1086_s23 }
 0x1d3   :  { %v208_v63 = vpop.permute.xlu1 %207 }
 0x1d4   :  { %v206_v0 = vpop.permute.xlu0 %205  ;;  %v228_v4 = vsel %vm226_vm11, %v907_v46, %v208_v63 }
 0x1d5   :  { %v227_v2 = vsel %vm226_vm11, %v132_v51, %v206_v0  ;;  %v377_v0 = vld [vmem:[%s1349_s5 + $0x20] sm:$0xff] }
 0x1d7   :  { %v223_v1 = vpop.permute.xlu1 %222 }
 0x1d8   :  { %v221_v3 = vpop.permute.xlu0 %220  ;;  %v230_v6 = vsel %vm59_vm4, %v228_v4, %v223_v1  ;;  %v378_v1 = vld [vmem:[%s1349_s5 + $0x28] sm:$0xff] }
 0x1d9   :  { %v229_v5 = vsel %vm59_vm4, %v227_v2, %v221_v3  ;;  %v992_v3 = vpack.c.bf16 %v378_v1, %v377_v0 }
 0x1da   :  { %920 = vmatprep.mubr.msk.f32.mxu1 %vm237_vm12, %v229_v5 }
 0x1db   :  { %921 = vmatmul.mubr.msk.f32.vlgmr.msra.gmra.mrb[0].mxu1 %vm237_vm12, %v230_v6  ;;  %993 = vmatprep.subr.bf16.mxu0 %v992_v3 }
 0x1dc   :  { %995 = vmatpush3.bf16.msra.mxu0 %v992_v3 }
 0x2ae   :  { %v922_v14 = vpop.f32.mrb[0].mxu1 }
 0x2af   :  { %v316_v15 = vadd.f32 %v922_v14, %v849_v13  ;;  %v310_v16 = vpop.f32.mrb[1].mxu1 }
 0x2b0   :  { %v311_v17 = vadd.f32 %v849_v13, %v310_v16 }
 0x2b1   :  { %v322_v18 = vmul.f32 0.70710677, %v316_v15  ;;  %v320_v6 = vmul.f32 0.5, %v316_v15 }
 0x2b2   :  { %v321_v19 = vmul.f32 0.70710677, %v311_v17  ;;  %v319_v9 = vmul.f32 0.5, %v311_v17 }
 0x2b3   :  { %v324_v20 = vand.u32 2147483647, %v322_v18  ;;  %vm364_vm13 = vcmp.ge.f32.partialorder %v322_v18, 0.0 }
 0x2b4   :  { %v323_v21 = vand.u32 2147483647, %v321_v19  ;;  %vm363_vm14 = vcmp.ge.f32.partialorder %v321_v19, 0.0 }
 0x2b5   :  { %v326_v22 = vmul.f32 0.3275911, %v324_v20  ;;  %v352_v26 = vsub.f32 0.0, %v324_v20 }
 0x2b6   :  { %v325_v23 = vmul.f32 0.3275911, %v323_v21  ;;  %v351_v27 = vsub.f32 0.0, %v323_v21 }
 0x2b7   :  { %v328_v24 = vadd.f32 1.0, %v326_v22  ;;  %v354_v29 = vmul.f32 %v352_v26, %v324_v20 }
 0x2b8   :  { %v327_v25 = vadd.f32 1.0, %v325_v23  ;;  %v353_v32 = vmul.f32 %v351_v27, %v323_v21 }
 0x2b9   :  { %1035 = vrcp.f32 %v328_v24  ;;  %v357_v35 = vmul.f32 1.442695, %v354_v29 }
 0x2ba   :  { %1037 = vrcp.f32 %v327_v25  ;;  %v355_v38 = vmul.f32 1.442695, %v353_v32 }
 0x2bb   :  { %1039 = vpow2.f32 %v357_v35  ;;  %v555_v35 = vld [vmem:[%s1351_s7 + $0x10] sm:$0xff] }
 0x2bc   :  { %1041 = vpow2.f32 %v355_v38 }
 0x2c3   :  { %v1036_v28 = vpop.eup %1035 }
 0x2c4   :  { %v1038_v30 = vpop.eup %1037  ;;  %v334_v31 = vmul.f32 1.0614054, %v1036_v28 }
 0x2c5   :  { %v333_v33 = vmul.f32 1.0614054, %v1038_v30  ;;  %v1040_v56 = vpop.eup %1039 }
 0x2c6   :  { %v336_v34 = vadd.f32 -1.4531521, %v334_v31  ;;  %v1042_v59 = vpop.eup %1041 }
 0x2c7   :  { %v335_v36 = vadd.f32 -1.4531521, %v333_v33  ;;  %v553_v33 = vld [vmem:[%s1351_s7] sm:$0xff] }
 0x2c8   :  { %v338_v37 = vmul.f32 %v1036_v28, %v336_v34  ;;  %v554_v34 = vld [vmem:[%s1351_s7 + $0x8] sm:$0xff] }
 0x2c9   :  { %v337_v40 = vmul.f32 %v1038_v30, %v335_v36  ;;  %v996_v36 = vpack.c.bf16 %v554_v34, %v553_v33 }
 0x2ca   :  { %v340_v42 = vadd.f32 1.4214138, %v338_v37  ;;  %v556_v37 = vld [vmem:[%s1351_s7 + $0x18] sm:$0xff] }
 0x2cb   :  { %v339_v43 = vadd.f32 1.4214138, %v337_v40  ;;  %v1000_v38 = vpack.c.bf16 %v556_v37, %v555_v35  ;;  %997 = vmatprep.subr.bf16.mxu1 %v996_v36  ;;  %v852_v40 = vld [vmem:[%s1350_s6] ss:$0 sm:$0xff] }
 0x2cc   :  { %v342_v46 = vmul.f32 %v1036_v28, %v340_v42  ;;  %999 = vmatpush3.bf16.msra.mxu1 %v996_v36 }
 0x2cd   :  { %v341_v48 = vmul.f32 %v1038_v30, %v339_v43  ;;  %1001 = vmatprep.subr.bf16.mxu1 %v1000_v38 }
 0x2ce   :  { %v344_v49 = vadd.f32 -0.28449672, %v342_v46 }
 0x2cf   :  { %v343_v50 = vadd.f32 -0.28449672, %v341_v48 }
 0x2d0   :  { %v346_v51 = vmul.f32 %v1036_v28, %v344_v49  ;;  %1003 = vmatpush3.bf16.msra.mxu1 %v1000_v38 }
 0x2d1   :  { %v345_v52 = vmul.f32 %v1038_v30, %v343_v50 }
 0x2d2   :  { %v348_v53 = vadd.f32 0.2548296, %v346_v51 }
 0x2d3   :  { %v347_v54 = vadd.f32 0.2548296, %v345_v52 }
 0x2d4   :  { %v350_v55 = vmul.f32 %v1036_v28, %v348_v53 }
 0x2d5   :  { %v349_v57 = vmul.f32 %v1038_v30, %v347_v54 }
 0x2d6   :  { %v360_v60 = vmul.f32 %v1040_v56, %v350_v55 }
 0x2d7   :  { %v359_v61 = vmul.f32 %v1042_v59, %v349_v57 }
 0x2d8   :  { %v362_v62 = vsub.f32 1.0, %v360_v60 }
 0x2d9   :  { %v361_v63 = vsub.f32 1.0, %v359_v61 }
 0x2da   :  { %v366_v2 = vsub.f32 0.0, %v362_v62 }
 0x2db   :  { %v365_v4 = vsub.f32 0.0, %v361_v63 }
 0x2dc   :  { %v368_v5 = vsel %vm364_vm13, %v362_v62, %v366_v2 }
 0x2dd   :  { %v370_v7 = vadd.f32 1.0, %v368_v5  ;;  %v367_v8 = vsel %vm363_vm14, %v361_v63, %v365_v4 }
 0x2de   :  { %v369_v10 = vadd.f32 1.0, %v367_v8 }
 0x2df   :  { %v372_v11 = vmul.f32 %v370_v7, %v320_v6 }
 0x2e0   :  { %v371_v12 = vmul.f32 %v369_v10, %v319_v9 }
 0x2e1   :  { %v381_v13 = vmul.f32 %v372_v11, %v1199_v44  ;;  %v383_v14 = vmul.f32 %v372_v11, %v1202_v45 }
 0x2e2   :  { %v380_v16 = vmul.f32 %v371_v12, %v1194_v39  ;;  %v382_v18 = vmul.f32 %v371_v12, %v1196_v41 }
 0x2e3   :  { %v387_v20 = vrot.slane %v381_v13, 1  ;;  %v399_v19 = vrot.slane %v383_v14, 2 }
 0x2e4   :  { %v386_v21 = vrot.slane %v380_v16, 1  ;;  %v398_v22 = vrot.slane %v382_v18, 2 }
 0x2e5   :  { %v389_v15 = vsel %vm199_vm9, %v387_v20, %v1204_v47  ;;  %v401_v23 = vsel %vm214_vm10, %v399_v19, %v1210_v58 }
 0x2e6   :  { %392 = vrot.lane.b32.xlu1 %v389_v15, %s1085_s3  ;;  %v388_v17 = vsel %vm199_vm9, %v386_v21, %v387_v20  ;;  %v400_v24 = vsel %vm214_vm10, %v398_v22, %v399_v19 }
 0x2e7   :  { %390 = vrot.lane.b32.xlu0 %v388_v17, %s1085_s3 }
 0x2ea   :  { %404 = vrot.lane.b32.xlu1 %v401_v23, %s1086_s23 }
 0x2eb   :  { %402 = vrot.lane.b32.xlu0 %v400_v24, %s1086_s23 }
 0x358   :  { %v393_v25 = vpop.permute.xlu1 %392 }
 0x359   :  { %v391_v26 = vpop.permute.xlu0 %390  ;;  %v409_v30 = vsel %vm226_vm11, %v372_v11, %v393_v25 }
 0x35a   :  { %v408_v28 = vsel %vm226_vm11, %v371_v12, %v391_v26  ;;  %v557_v26 = vld [vmem:[%s1351_s7 + $0x20] sm:$0xff] }
 0x35c   :  { %v405_v27 = vpop.permute.xlu1 %404 }
 0x35d   :  { %v403_v29 = vpop.permute.xlu0 %402  ;;  %v411_v32 = vsel %vm59_vm4, %v409_v30, %v405_v27  ;;  %v558_v27 = vld [vmem:[%s1351_s7 + $0x28] sm:$0xff] }
 0x35e   :  { %v410_v31 = vsel %vm59_vm4, %v408_v28, %v403_v29  ;;  %v1004_v29 = vpack.c.bf16 %v558_v27, %v557_v26 }
 0x35f   :  { %935 = vmatprep.mubr.msk.f32.mxu0 %vm237_vm12, %v410_v31 }
 0x360   :  { %936 = vmatmul.mubr.msk.f32.vlgmr.msra.gmra.mrb[2].mxu0 %vm237_vm12, %v411_v32  ;;  %1005 = vmatprep.subr.bf16.mxu1 %v1004_v29 }
 0x361   :  { %1007 = vmatpush3.bf16.msra.mxu1 %v1004_v29 }
 0x433   :  { %v937_v42 = vpop.f32.mrb[2].mxu0 }
 0x434   :  { %v496_v43 = vadd.f32 %v937_v42, %v852_v40  ;;  %v490_v46 = vpop.f32.mrb[3].mxu0 }
 0x435   :  { %v491_v48 = vadd.f32 %v852_v40, %v490_v46 }
 0x436   :  { %v502_v49 = vmul.f32 0.70710677, %v496_v43  ;;  %v500_v32 = vmul.f32 0.5, %v496_v43 }
 0x437   :  { %v501_v50 = vmul.f32 0.70710677, %v491_v48  ;;  %v499_v35 = vmul.f32 0.5, %v491_v48 }
 0x438   :  { %v504_v51 = vand.u32 2147483647, %v502_v49  ;;  %vm544_vm15 = vcmp.ge.f32.partialorder %v502_v49, 0.0 }
 0x439   :  { %v503_v52 = vand.u32 2147483647, %v501_v50  ;;  %vm543_vm0 = vcmp.ge.f32.partialorder %v501_v50, 0.0 }
 0x43a   :  { %v506_v53 = vmul.f32 0.3275911, %v504_v51  ;;  %v532_v57 = vsub.f32 0.0, %v504_v51 }
 0x43b   :  { %v505_v54 = vmul.f32 0.3275911, %v503_v52  ;;  %v531_v59 = vsub.f32 0.0, %v503_v52 }
 0x43c   :  { %v508_v55 = vadd.f32 1.0, %v506_v53  ;;  %v534_v61 = vmul.f32 %v532_v57, %v504_v51 }
 0x43d   :  { %v507_v56 = vadd.f32 1.0, %v505_v54  ;;  %v533_v0 = vmul.f32 %v531_v59, %v503_v52 }
 0x43e   :  { %1043 = vrcp.f32 %v508_v55  ;;  %v537_v3 = vmul.f32 1.442695, %v534_v61 }
 0x43f   :  { %1045 = vrcp.f32 %v507_v56  ;;  %v535_v6 = vmul.f32 1.442695, %v533_v0 }
 0x440   :  { %1047 = vpow2.f32 %v537_v3 }
 0x441   :  { %1049 = vpow2.f32 %v535_v6 }
 0x448   :  { %v1044_v60 = vpop.eup %1043 }
 0x449   :  { %v1046_v62 = vpop.eup %1045  ;;  %v514_v63 = vmul.f32 1.0614054, %v1044_v60 }
 0x44a   :  { %v513_v1 = vmul.f32 1.0614054, %v1046_v62  ;;  %v1048_v15 = vpop.eup %1047 }
 0x44b   :  { %v516_v2 = vadd.f32 -1.4531521, %v514_v63  ;;  %v1050_v17 = vpop.eup %1049  ;;  %v736_v63 = vld [vmem:[%s1353_s9 + $0x18] sm:$0xff] }
 0x44c   :  { %v515_v4 = vadd.f32 -1.4531521, %v513_v1  ;;  %v855_v1 = vld [vmem:[%s1352_s8] ss:$0 sm:$0xff] }
 0x44d   :  { %v518_v5 = vmul.f32 %v1044_v60, %v516_v2 }
 0x44e   :  { %v517_v7 = vmul.f32 %v1046_v62, %v515_v4 }
 0x44f   :  { %v520_v8 = vadd.f32 1.4214138, %v518_v5 }
 0x450   :  { %v519_v9 = vadd.f32 1.4214138, %v517_v7 }
 0x451   :  { %v522_v10 = vmul.f32 %v1044_v60, %v520_v8 }
 0x452   :  { %v521_v11 = vmul.f32 %v1046_v62, %v519_v9 }
 0x453   :  { %v524_v12 = vadd.f32 -0.28449672, %v522_v10 }
 0x454   :  { %v523_v13 = vadd.f32 -0.28449672, %v521_v11 }
 0x455   :  { %v526_v14 = vmul.f32 %v1044_v60, %v524_v12 }
 0x456   :  { %v525_v16 = vmul.f32 %v1046_v62, %v523_v13 }
 0x457   :  { %v528_v18 = vadd.f32 0.2548296, %v526_v14 }
 0x458   :  { %v527_v20 = vadd.f32 0.2548296, %v525_v16 }
 0x459   :  { %v530_v21 = vmul.f32 %v1044_v60, %v528_v18  ;;  %v734_v60 = vld [vmem:[%s1353_s9 + $0x8] sm:$0xff] }
 0x45a   :  { %v529_v19 = vmul.f32 %v1046_v62, %v527_v20  ;;  %v735_v62 = vld [vmem:[%s1353_s9 + $0x10] sm:$0xff] }
 0x45b   :  { %v540_v22 = vmul.f32 %v1048_v15, %v530_v21  ;;  %v1012_v0 = vpack.c.bf16 %v736_v63, %v735_v62 }
 0x45c   :  { %v539_v23 = vmul.f32 %v1050_v17, %v529_v19 }
 0x45d   :  { %v542_v24 = vsub.f32 1.0, %v540_v22 }
 0x45e   :  { %v541_v25 = vsub.f32 1.0, %v539_v23 }
 0x45f   :  { %v546_v28 = vsub.f32 0.0, %v542_v24 }
 0x460   :  { %v545_v30 = vsub.f32 0.0, %v541_v25 }
 0x461   :  { %v548_v31 = vsel %vm544_vm15, %v542_v24, %v546_v28 }
 0x462   :  { %v550_v33 = vadd.f32 1.0, %v548_v31  ;;  %v547_v34 = vsel %vm543_vm0, %v541_v25, %v545_v30 }
 0x463   :  { %v549_v36 = vadd.f32 1.0, %v547_v34 }
 0x464   :  { %v552_v37 = vmul.f32 %v550_v33, %v500_v32 }
 0x465   :  { %v551_v38 = vmul.f32 %v549_v36, %v499_v35 }
 0x466   :  { %v561_v40 = vmul.f32 %v552_v37, %v1199_v44  ;;  %v563_v42 = vmul.f32 %v552_v37, %v1202_v45 }
 0x467   :  { %v560_v46 = vmul.f32 %v551_v38, %v1194_v39  ;;  %v562_v49 = vmul.f32 %v551_v38, %v1196_v41 }
 0x468   :  { %v567_v51 = vrot.slane %v561_v40, 1  ;;  %v579_v50 = vrot.slane %v563_v42, 2 }
 0x469   :  { %v566_v52 = vrot.slane %v560_v46, 1  ;;  %v578_v53 = vrot.slane %v562_v49, 2 }
 0x46a   :  { %v569_v43 = vsel %vm199_vm9, %v567_v51, %v1204_v47  ;;  %v581_v44 = vsel %vm214_vm10, %v579_v50, %v1210_v58  ;;  %v733_v58 = vld [vmem:[%s1353_s9] sm:$0xff] }
 0x46b   :  { %572 = vrot.lane.b32.xlu1 %v569_v43, %s1085_s3  ;;  %v568_v48 = vsel %vm199_vm9, %v566_v52, %v567_v51  ;;  %v580_v39 = vsel %vm214_vm10, %v578_v53, %v579_v50  ;;  %v1008_v61 = vpack.c.bf16 %v734_v60, %v733_v58 }
 0x46c   :  { %570 = vrot.lane.b32.xlu0 %v568_v48, %s1085_s3 }
 0x46d   :  { %1009 = vmatprep.subr.bf16.mxu0 %v1008_v61 }
 0x46e   :  { %1011 = vmatpush3.bf16.msra.mxu0 %v1008_v61 }
 0x46f   :  { %584 = vrot.lane.b32.xlu1 %v581_v44, %s1086_s23  ;;  %1013 = vmatprep.subr.bf16.mxu0 %v1012_v0 }
 0x470   :  { %582 = vrot.lane.b32.xlu0 %v580_v39, %s1086_s23 }
 0x472   :  { %1015 = vmatpush3.bf16.msra.mxu0 %v1012_v0 }
 0x4dd   :  { %v573_v41 = vpop.permute.xlu1 %572 }
 0x4de   :  { %v571_v45 = vpop.permute.xlu0 %570  ;;  %v589_v56 = vsel %vm226_vm11, %v552_v37, %v573_v41 }
 0x4df   :  { %v588_v54 = vsel %vm226_vm11, %v551_v38, %v571_v45 }
 0x4e1   :  { %v585_v47 = vpop.permute.xlu1 %584 }
 0x4e2   :  { %v583_v55 = vpop.permute.xlu0 %582  ;;  %v591_v59 = vsel %vm59_vm4, %v589_v56, %v585_v47  ;;  %v858_v56 = vld [vmem:[%s1354_s10] ss:$0 sm:$0xff] }
 0x4e3   :  { %v590_v57 = vsel %vm59_vm4, %v588_v54, %v583_v55 }
 0x4e4   :  { %950 = vmatprep.mubr.msk.f32.mxu1 %vm237_vm12, %v590_v57 }
 0x4e5   :  { %951 = vmatmul.mubr.msk.f32.vlgmr.msra.gmra.mrb[2].mxu1 %vm237_vm12, %v591_v59 }
 0x5b8   :  { %v952_v2 = vpop.f32.mrb[2].mxu1 }
 0x5b9   :  { %v676_v3 = vadd.f32 %v952_v2, %v855_v1  ;;  %v670_v4 = vpop.f32.mrb[3].mxu1 }
 0x5ba   :  { %v671_v5 = vadd.f32 %v855_v1, %v670_v4 }
 0x5bb   :  { %v682_v6 = vmul.f32 0.70710677, %v676_v3  ;;  %v680_v47 = vmul.f32 0.5, %v676_v3 }
 0x5bc   :  { %v681_v7 = vmul.f32 0.70710677, %v671_v5  ;;  %v679_v41 = vmul.f32 0.5, %v671_v5 }
 0x5bd   :  { %v684_v8 = vand.u32 2147483647, %v682_v6  ;;  %vm724_vm1 = vcmp.ge.f32.partialorder %v682_v6, 0.0 }
 0x5be   :  { %v683_v9 = vand.u32 2147483647, %v681_v7  ;;  %vm723_vm2 = vcmp.ge.f32.partialorder %v681_v7, 0.0 }
 0x5bf   :  { %v686_v10 = vmul.f32 0.3275911, %v684_v8  ;;  %v712_v14 = vsub.f32 0.0, %v684_v8 }
 0x5c0   :  { %v685_v11 = vmul.f32 0.3275911, %v683_v9  ;;  %v711_v16 = vsub.f32 0.0, %v683_v9 }
 0x5c1   :  { %v688_v12 = vadd.f32 1.0, %v686_v10  ;;  %v714_v20 = vmul.f32 %v712_v14, %v684_v8 }
 0x5c2   :  { %v687_v13 = vadd.f32 1.0, %v685_v11  ;;  %v713_v19 = vmul.f32 %v711_v16, %v683_v9 }
 0x5c3   :  { %1051 = vrcp.f32 %v688_v12  ;;  %v717_v23 = vmul.f32 1.442695, %v714_v20 }
 0x5c4   :  { %1053 = vrcp.f32 %v687_v13  ;;  %v715_v26 = vmul.f32 1.442695, %v713_v19 }
 0x5c5   :  { %1055 = vpow2.f32 %v717_v23 }
 0x5c6   :  { %1057 = vpow2.f32 %v715_v26 }
 0x5cd   :  { %v1052_v18 = vpop.eup %1051 }
 0x5ce   :  { %v1054_v21 = vpop.eup %1053  ;;  %v694_v15 = vmul.f32 1.0614054, %v1052_v18 }
 0x5cf   :  { %v693_v17 = vmul.f32 1.0614054, %v1054_v21  ;;  %v1056_v40 = vpop.eup %1055 }
 0x5d0   :  { %v696_v22 = vadd.f32 -1.4531521, %v694_v15  ;;  %v1058_v46 = vpop.eup %1057 }
 0x5d1   :  { %v695_v24 = vadd.f32 -1.4531521, %v693_v17 }
 0x5d2   :  { %v698_v25 = vmul.f32 %v1052_v18, %v696_v22 }
 0x5d3   :  { %v697_v27 = vmul.f32 %v1054_v21, %v695_v24 }
 0x5d4   :  { %v700_v28 = vadd.f32 1.4214138, %v698_v25 }
 0x5d5   :  { %v699_v29 = vadd.f32 1.4214138, %v697_v27 }
 0x5d6   :  { %v702_v30 = vmul.f32 %v1052_v18, %v700_v28 }
 0x5d7   :  { %v701_v31 = vmul.f32 %v1054_v21, %v699_v29 }
 0x5d8   :  { %v704_v32 = vadd.f32 -0.28449672, %v702_v30 }
 0x5d9   :  { %v703_v33 = vadd.f32 -0.28449672, %v701_v31 }
 0x5da   :  { %v706_v34 = vmul.f32 %v1052_v18, %v704_v32 }
 0x5db   :  { %v705_v35 = vmul.f32 %v1054_v21, %v703_v33 }
 0x5dc   :  { %v708_v36 = vadd.f32 0.2548296, %v706_v34 }
 0x5dd   :  { %v707_v37 = vadd.f32 0.2548296, %v705_v35 }
 0x5de   :  { %v710_v38 = vmul.f32 %v1052_v18, %v708_v36 }
 0x5df   :  { %v709_v42 = vmul.f32 %v1054_v21, %v707_v37 }
 0x5e0   :  { %v720_v49 = vmul.f32 %v1056_v40, %v710_v38 }
 0x5e1   :  { %v719_v51 = vmul.f32 %v1058_v46, %v709_v42 }
 0x5e2   :  { %v722_v52 = vsub.f32 1.0, %v720_v49 }
 0x5e3   :  { %v721_v43 = vsub.f32 1.0, %v719_v51 }
 0x5e4   :  { %v726_v50 = vsub.f32 0.0, %v722_v52 }
 0x5e5   :  { %v725_v48 = vsub.f32 0.0, %v721_v43 }
 0x5e6   :  { %v728_v53 = vsel %vm724_vm1, %v722_v52, %v726_v50 }
 0x5e7   :  { %v730_v44 = vadd.f32 1.0, %v728_v53  ;;  %v727_v39 = vsel %vm723_vm2, %v721_v43, %v725_v48 }
 0x5e8   :  { %v729_v45 = vadd.f32 1.0, %v727_v39 }
 0x5e9   :  { %v732_v55 = vmul.f32 %v730_v44, %v680_v47 }
 0x5ea   :  { %v731_v54 = vmul.f32 %v729_v45, %v679_v41 }
 0x5ec   :  { %961 = vmatprep.mubr.msk.f32.mxu0 %vm59_vm4, %v731_v54 }
 0x5ed   :  { %962 = vmatmul.mubr.msk.f32.vlgmr.msra.gmra.mrb[4].mxu0 %vm59_vm4, %v732_v55 }
 0x6c0   :  { %v963_v57 = vpop.f32.mrb[4].mxu0 }
 0x6c1   :  { %v822_v59 = vadd.f32 %v963_v57, %v858_v56  ;;  %v816_v58 = vpop.f32.mrb[5].mxu0 }
 0x6c2   :  { %v817_v60 = vadd.f32 %v858_v56, %v816_v58 }
 0x6c3   :  { %826 = vst.msk [vmem:[#allocation2 + $0x8] sm:$0xff] %vm59_vm4, %v822_v59 }
 0x6c4   :  { %825 = vst.msk [vmem:[#allocation2] sm:$0xff] %vm59_vm4, %v817_v60 }
 0x6c5   :  { %1070 = shalt.err (!%p1067_p4)
}
 0x6c6   :  { %s1071_s15 = scalar_lea.hbm %s1355_s11, 256 }
 0x6c7   :  { %p1072_p5 = scmp.ne.s32.totalorder %s1355_s11, %s1071_s15  ;;  %p1075_p6 = scmp.lt.u32.totalorder %s1071_s15, %s1355_s11 }
 0x6c9   :  { %p1077_p7 = pnand %p1075_p6, %p1072_p5 }
 0x6cb   :  { %1080 = shalt.err (!%p1077_p7)
}
 0x6cc   :  { %s1088_s20 = smov 128   ;;  %s1089_s21 = smov 8  }
 0x6cd   :  { %838 = dma.vmem_to_hbm [thread:$0]  %s833_s2, 256, %s1355_s11, [#allocation3], %s1088_s20, %s1088_s20, %s1089_s21  }
 0x6ce   :  { %1081 = dma.done.wait [#allocation3], 256  }
 0x6cf   :  { %1082 = vsyncadd [#allocation3], 4294967040 }
 0x6d0   :  { %842 = vsyncpa [#allocation3], 1 }

</bundles_post_ra>
